<compile_context>
chip_gen: v6e
topology: v6e:2x2x1
jax: 0.10.0
libtpu: 0.0.40
codegen_flags: <defaults>
</compile_context>

<pallas_src>
import functools

import jax
import jax.numpy as jnp
from jax.experimental import pallas as pl
from jax.experimental.pallas import tpu as pltpu


def _round_up(x, m):
    return ((x + m - 1) // m) * m


def _context_gate_kernel(src_ref, tgt_ref,
                         wg_s_ref, wg_t_ref, bg_ref,
                         ws_ref, bs_ref,
                         wt_ref, bt_ref,
                         out_ref, *, gate_type):
    src = src_ref[...]
    tgt = tgt_ref[...]

    # gate = sigmoid( cat(src, tgt) @ Wg + bg )
    #      = sigmoid( src @ Wg_src + tgt @ Wg_tgt + bg )     (concat fused)
    gate_logits = (jnp.dot(src, wg_s_ref[...], preferred_element_type=jnp.float32)
                   + jnp.dot(tgt, wg_t_ref[...], preferred_element_type=jnp.float32)
                   + bg_ref[...])
    z = jax.nn.sigmoid(gate_logits)                                  # f32, EUP

    ps = jnp.dot(src, ws_ref[...], preferred_element_type=jnp.float32) + bs_ref[...]
    pt = jnp.dot(tgt, wt_ref[...], preferred_element_type=jnp.float32) + bt_ref[...]

    if gate_type == 'all':
        out = pt + z * (ps - pt)          # == z*ps + (1-z)*pt, one fewer vmul
    elif gate_type == 'src':
        out = pt + z * ps                 # == z*ps + pt
    elif gate_type == 'tgt':
        out = ps + pt - z * pt            # == ps + (1-z)*pt
    else:
        raise NotImplementedError(f'gate_type {gate_type} is not defined')

    out_ref[...] = out.astype(out_ref.dtype)


def prepare_params(params, source_size, *, matmul_dtype=jnp.bfloat16,
                   lane_multiple=128):
    """One-time parameter prep (call at init time, NOT per forward step).

    - Splits the gate weight into its source/target halves (fuses the concat).
    - Zero-pads all feature dims to `lane_multiple` (128) for MXU / lane-dense
      stores.
    - Optionally casts matmul weights to bf16 (halves HBM/VMEM weight bytes;
      ~2x MXU throughput on v6e/v7x).  Biases stay f32.
    """
    wg, ws, wt = params['wg'], params['ws'], params['wt']
    bg, bs, bt = params['bg'], params['bs'], params['bt']
    target_size = wg.shape[0] - source_size
    output_size = wg.shape[1]

    s_p = _round_up(source_size, lane_multiple)
    t_p = _round_up(target_size, lane_multiple)
    o_p = _round_up(output_size, lane_multiple)

    w_dtype = matmul_dtype if matmul_dtype is not None else wg.dtype

    def pad_w(w, rows, cols):
        return jnp.pad(w, ((0, rows - w.shape[0]), (0, cols - w.shape[1]))).astype(w_dtype)

    def pad_b(b, cols):
        return jnp.pad(b, ((0, 0), (0, cols - b.shape[1]))).astype(jnp.float32)

    return {
        'wg_s': pad_w(wg[:source_size, :], s_p, o_p),
        'wg_t': pad_w(wg[source_size:, :], t_p, o_p),
        'ws': pad_w(ws, s_p, o_p),
        'wt': pad_w(wt, t_p, o_p),
        'bg': pad_b(bg, o_p),
        'bs': pad_b(bs, o_p),
        'bt': pad_b(bt, o_p),
        'source_size': source_size,
        'target_size': target_size,
        'output_size': output_size,
        's_p': s_p, 't_p': t_p, 'o_p': o_p,
        'matmul_dtype': w_dtype,
    }


def context_gate(source_var, target_var, prepared, gate_type='all', *,
                 block_m=256, vmem_limit_bytes=None):
    """Pallas forward pass of ContextGate using prepared (split/padded) params.

    source_var: [B, source_size] float32
    target_var: [B, target_size] float32
    prepared:   output of prepare_params(...)
    """
    assert source_var.shape[0] == target_var.shape[0]
    batch = source_var.shape[0]
    src_size = prepared['source_size']
    tgt_size = prepared['target_size']
    out_size = prepared['output_size']
    s_p, t_p, o_p = prepared['s_p'], prepared['t_p'], prepared['o_p']
    assert source_var.shape[1] == src_size and target_var.shape[1] == tgt_size

    out_dtype = source_var.dtype
    act_dtype = prepared['matmul_dtype']

    # Batch tile: multiple of 8 sublanes, clamped so tiny demo batches don't
    # blow up the padded problem size.  At realistic batch sizes this is
    # block_m (256 on v6e/v7x, pass block_m=128 on v5e).
    tile_m = min(block_m, _round_up(batch, 8))
    b_p = _round_up(batch, tile_m)

    src = jnp.pad(source_var, ((0, b_p - batch), (0, s_p - src_size))).astype(act_dtype)
    tgt = jnp.pad(target_var, ((0, b_p - batch), (0, t_p - tgt_size))).astype(act_dtype)

    grid = (b_p // tile_m,)

    act_bytes = jnp.dtype(act_dtype).itemsize
    weight_bytes = 2 * (s_p + t_p) * o_p * act_bytes            # wg split + ws/wt
    flops = 4 * b_p * (s_p + t_p) * o_p + 6 * b_p * o_p
    bytes_accessed = (b_p * (s_p + t_p) * act_bytes + weight_bytes
                      + 3 * o_p * 4
                      + b_p * o_p * jnp.dtype(out_dtype).itemsize)
    cost = pl.CostEstimate(flops=flops,
                           transcendentals=b_p * o_p,           # sigmoid
                           bytes_accessed=bytes_accessed)

    kernel = functools.partial(_context_gate_kernel, gate_type=gate_type)

    # Activations / output: blocked along batch (double-buffered, pipelined).
    # Weights / biases: constant block index -> fetched once, resident in VMEM.
    # TODO(synk): on v7x (64 MiB VMEM) add pipeline_mode=pl.Buffered(1) to the
    # weight specs to avoid double-buffering the resident weights.
    in_specs = [
        pl.BlockSpec((tile_m, s_p), lambda i: (i, 0)),   # src tile
        pl.BlockSpec((tile_m, t_p), lambda i: (i, 0)),   # tgt tile
        pl.BlockSpec((s_p, o_p), lambda i: (0, 0)),      # wg_src
        pl.BlockSpec((t_p, o_p), lambda i: (0, 0)),      # wg_tgt
        pl.BlockSpec((1, o_p), lambda i: (0, 0)),        # bg
        pl.BlockSpec((s_p, o_p), lambda i: (0, 0)),      # ws
        pl.BlockSpec((1, o_p), lambda i: (0, 0)),        # bs
        pl.BlockSpec((t_p, o_p), lambda i: (0, 0)),      # wt
        pl.BlockSpec((1, o_p), lambda i: (0, 0)),        # bt
    ]
    out_spec = pl.BlockSpec((tile_m, o_p), lambda i: (i, 0))

    out_padded = pl.pallas_call(
        kernel,
        out_shape=jax.ShapeDtypeStruct((b_p, o_p), out_dtype),
        grid=grid,
        in_specs=in_specs,
        out_specs=out_spec,
        compiler_params=pltpu.CompilerParams(
            dimension_semantics=("parallel",),
            vmem_limit_bytes=vmem_limit_bytes),
        cost_estimate=cost,
    )(src, tgt,
      prepared['wg_s'], prepared['wg_t'], prepared['bg'],
      prepared['ws'], prepared['bs'],
      prepared['wt'], prepared['bt'])

    return out_padded[:batch, :out_size]


def init_params(key, source_size, target_size, output_size):
    input_size = source_size + target_size
    ks = jax.random.split(key, 6)
    scale = 0.1
    return {
        'wg': scale * jax.random.normal(ks[0], (input_size, output_size), jnp.float32),
        'bg': scale * jax.random.normal(ks[1], (1, output_size), jnp.float32),
        'ws': scale * jax.random.normal(ks[2], (source_size, output_size), jnp.float32),
        'bs': scale * jax.random.normal(ks[3], (1, output_size), jnp.float32),
        'wt': scale * jax.random.normal(ks[4], (target_size, output_size), jnp.float32),
        'bt': scale * jax.random.normal(ks[5], (1, output_size), jnp.float32),
    }


def _reference(source_var, target_var, params, gate_type):
    x = jnp.concatenate([source_var, target_var], axis=1)
    z = jax.nn.sigmoid(x @ params['wg'] + params['bg'])
    ps = source_var @ params['ws'] + params['bs']
    pt = target_var @ params['wt'] + params['bt']
    if gate_type == 'all':
        return z * ps + (1.0 - z) * pt
    elif gate_type == 'src':
        return z * ps + pt
    else:
        return ps + (1.0 - z) * pt


if __name__ == "__main__":
    key = jax.random.PRNGKey(0)
    k_src, k_tgt, k_par = jax.random.split(key, 3)

    batch = 8
    source_size = 32
    target_size = 32
    output_size = 32

    source_var = jax.random.normal(k_src, (batch, source_size), jnp.float32)
    target_var = jax.random.normal(k_tgt, (batch, target_size), jnp.float32)
    params = init_params(k_par, source_size, target_size, output_size)

    ok = True

    # f32 matmul path (tight tolerance).
    prep_f32 = prepare_params(params, source_size, matmul_dtype=None)
    for gate_type in ('all', 'src', 'tgt'):
        out = jax.block_until_ready(
            context_gate(source_var, target_var, prep_f32, gate_type=gate_type))
        ref = _reference(source_var, target_var, params, gate_type)
        if not jnp.allclose(out, ref, atol=1e-5, rtol=1e-5):
            ok = False

    # bf16 matmul fast path (looser tolerance vs f32 reference).
    prep_bf16 = prepare_params(params, source_size, matmul_dtype=jnp.bfloat16)
    for gate_type in ('all', 'src', 'tgt'):
        out = jax.block_until_ready(
            context_gate(source_var, target_var, prep_bf16, gate_type=gate_type))
        ref = _reference(source_var, target_var, params, gate_type)
        if not jnp.allclose(out, ref, atol=5e-2, rtol=5e-2):
            ok = False

    if ok:
        print("KERNEL_OK")
</pallas_src>

<mosaic_0001>
module attributes {stable_mosaic.version = 11 : i64} {
  func.func @_context_gate_kernel(%arg0: i32, %arg1: memref<8x128xf32, #tpu.memory_space<vmem>>, %arg2: memref<8x128xf32, #tpu.memory_space<vmem>>, %arg3: memref<128x128xf32, #tpu.memory_space<vmem>>, %arg4: memref<128x128xf32, #tpu.memory_space<vmem>>, %arg5: memref<1x128xf32, #tpu.memory_space<vmem>>, %arg6: memref<128x128xf32, #tpu.memory_space<vmem>>, %arg7: memref<1x128xf32, #tpu.memory_space<vmem>>, %arg8: memref<128x128xf32, #tpu.memory_space<vmem>>, %arg9: memref<1x128xf32, #tpu.memory_space<vmem>>, %arg10: memref<8x128xf32, #tpu.memory_space<vmem>>) attributes {dimension_semantics = [#tpu.dimension_semantics<parallel>], iteration_bounds = array<i64: 1>, scalar_prefetch = 0 : i64, scratch_operands = 0 : i64, tpu.core_type = #tpu.core_type<tc>, window_params = [{transform_indices = @transform_0, window_bounds = array<i64: 8, 128>}, {transform_indices = @transform_1, window_bounds = array<i64: 8, 128>}, {pipeline_mode = #tpu.pipeline_mode<synchronous>, transform_indices = @transform_2, window_bounds = array<i64: 128, 128>}, {pipeline_mode = #tpu.pipeline_mode<synchronous>, transform_indices = @transform_3, window_bounds = array<i64: 128, 128>}, {pipeline_mode = #tpu.pipeline_mode<synchronous>, transform_indices = @transform_4, window_bounds = array<i64: 1, 128>}, {pipeline_mode = #tpu.pipeline_mode<synchronous>, transform_indices = @transform_5, window_bounds = array<i64: 128, 128>}, {pipeline_mode = #tpu.pipeline_mode<synchronous>, transform_indices = @transform_6, window_bounds = array<i64: 1, 128>}, {pipeline_mode = #tpu.pipeline_mode<synchronous>, transform_indices = @transform_7, window_bounds = array<i64: 128, 128>}, {pipeline_mode = #tpu.pipeline_mode<synchronous>, transform_indices = @transform_8, window_bounds = array<i64: 1, 128>}, {transform_indices = @transform_9, window_bounds = array<i64: 8, 128>}]} {
    %c0 = arith.constant 0 : index
    %c0_0 = arith.constant 0 : index
    %0 = vector.load %arg1[%c0, %c0_0] : memref<8x128xf32, #tpu.memory_space<vmem>>, vector<8x128xf32>
    %c0_1 = arith.constant 0 : index
    %c0_2 = arith.constant 0 : index
    %1 = vector.load %arg2[%c0_1, %c0_2] : memref<8x128xf32, #tpu.memory_space<vmem>>, vector<8x128xf32>
    %c0_3 = arith.constant 0 : index
    %c0_4 = arith.constant 0 : index
    %2 = vector.load %arg3[%c0_3, %c0_4] : memref<128x128xf32, #tpu.memory_space<vmem>>, vector<128x128xf32>
    %cst = arith.constant dense<0.000000e+00> : vector<8x128xf32>
    %3 = tpu.matmul %0, %2, %cst {dimension_numbers = #tpu.dot_dimension_numbers<[1], [0], [0], [1], [0, 0, 1, 1], [], []>} : vector<8x128xf32>, vector<128x128xf32>, vector<8x128xf32> -> vector<8x128xf32>
    %c0_5 = arith.constant 0 : index
    %c0_6 = arith.constant 0 : index
    %4 = vector.load %arg4[%c0_5, %c0_6] : memref<128x128xf32, #tpu.memory_space<vmem>>, vector<128x128xf32>
    %cst_7 = arith.constant dense<0.000000e+00> : vector<8x128xf32>
    %5 = tpu.matmul %1, %4, %cst_7 {dimension_numbers = #tpu.dot_dimension_numbers<[1], [0], [0], [1], [0, 0, 1, 1], [], []>} : vector<8x128xf32>, vector<128x128xf32>, vector<8x128xf32> -> vector<8x128xf32>
    %6 = arith.addf %3, %5 : vector<8x128xf32>
    %c0_8 = arith.constant 0 : index
    %c0_9 = arith.constant 0 : index
    %7 = vector.load %arg5[%c0_8, %c0_9] : memref<1x128xf32, #tpu.memory_space<vmem>>, vector<1x128xf32>
    %8 = vector.broadcast %7 : vector<1x128xf32> to vector<8x128xf32>
    %9 = arith.addf %6, %8 : vector<8x128xf32>
    %10 = arith.negf %9 : vector<8x128xf32>
    %11 = math.exp %10 : vector<8x128xf32>
    %cst_10 = arith.constant 1.000000e+00 : f32
    %12 = vector.broadcast %cst_10 : f32 to vector<8x128xf32>
    %13 = arith.addf %12, %11 : vector<8x128xf32>
    %14 = arith.divf %12, %13 : vector<8x128xf32>
    %c0_11 = arith.constant 0 : index
    %c0_12 = arith.constant 0 : index
    %15 = vector.load %arg6[%c0_11, %c0_12] : memref<128x128xf32, #tpu.memory_space<vmem>>, vector<128x128xf32>
    %cst_13 = arith.constant dense<0.000000e+00> : vector<8x128xf32>
    %16 = tpu.matmul %0, %15, %cst_13 {dimension_numbers = #tpu.dot_dimension_numbers<[1], [0], [0], [1], [0, 0, 1, 1], [], []>} : vector<8x128xf32>, vector<128x128xf32>, vector<8x128xf32> -> vector<8x128xf32>
    %c0_14 = arith.constant 0 : index
    %c0_15 = arith.constant 0 : index
    %17 = vector.load %arg7[%c0_14, %c0_15] : memref<1x128xf32, #tpu.memory_space<vmem>>, vector<1x128xf32>
    %18 = vector.broadcast %17 : vector<1x128xf32> to vector<8x128xf32>
    %19 = arith.addf %16, %18 : vector<8x128xf32>
    %c0_16 = arith.constant 0 : index
    %c0_17 = arith.constant 0 : index
    %20 = vector.load %arg8[%c0_16, %c0_17] : memref<128x128xf32, #tpu.memory_space<vmem>>, vector<128x128xf32>
    %cst_18 = arith.constant dense<0.000000e+00> : vector<8x128xf32>
    %21 = tpu.matmul %1, %20, %cst_18 {dimension_numbers = #tpu.dot_dimension_numbers<[1], [0], [0], [1], [0, 0, 1, 1], [], []>} : vector<8x128xf32>, vector<128x128xf32>, vector<8x128xf32> -> vector<8x128xf32>
    %c0_19 = arith.constant 0 : index
    %c0_20 = arith.constant 0 : index
    %22 = vector.load %arg9[%c0_19, %c0_20] : memref<1x128xf32, #tpu.memory_space<vmem>>, vector<1x128xf32>
    %23 = vector.broadcast %22 : vector<1x128xf32> to vector<8x128xf32>
    %24 = arith.addf %21, %23 : vector<8x128xf32>
    %25 = arith.subf %19, %24 : vector<8x128xf32>
    %26 = arith.mulf %14, %25 : vector<8x128xf32>
    %27 = arith.addf %24, %26 : vector<8x128xf32>
    %c0_21 = arith.constant 0 : index
    %c0_22 = arith.constant 0 : index
    %28 = vector.load %arg10[%c0_21, %c0_22] : memref<8x128xf32, #tpu.memory_space<vmem>>, vector<8x128xf32>
    tpu.vector_store %arg10[%c0_21, %c0_22], %27 {strides = array<i32>} : memref<8x128xf32, #tpu.memory_space<vmem>>, vector<8x128xf32>,
    return
  }
  func.func @transform_0(%arg0: i32) -> (i32, i32) {
    %c0_i32 = arith.constant 0 : i32
    %c0_i32_0 = arith.constant 0 : i32
    return %arg0, %c0_i32 : i32, i32
  }
  func.func @transform_1(%arg0: i32) -> (i32, i32) {
    %c0_i32 = arith.constant 0 : i32
    %c0_i32_0 = arith.constant 0 : i32
    return %arg0, %c0_i32 : i32, i32
  }
  func.func @transform_2(%arg0: i32) -> (i32, i32) {
    %c0_i32 = arith.constant 0 : i32
    %c0_i32_0 = arith.constant 0 : i32
    %c0_i32_1 = arith.constant 0 : i32
    return %c0_i32, %c0_i32_0 : i32, i32
  }
  func.func @transform_3(%arg0: i32) -> (i32, i32) {
    %c0_i32 = arith.constant 0 : i32
    %c0_i32_0 = arith.constant 0 : i32
    %c0_i32_1 = arith.constant 0 : i32
    return %c0_i32, %c0_i32_0 : i32, i32
  }
  func.func @transform_4(%arg0: i32) -> (i32, i32) {
    %c0_i32 = arith.constant 0 : i32
    %c0_i32_0 = arith.constant 0 : i32
    %c0_i32_1 = arith.constant 0 : i32
    return %c0_i32, %c0_i32_0 : i32, i32
  }
  func.func @transform_5(%arg0: i32) -> (i32, i32) {
    %c0_i32 = arith.constant 0 : i32
    %c0_i32_0 = arith.constant 0 : i32
    %c0_i32_1 = arith.constant 0 : i32
    return %c0_i32, %c0_i32_0 : i32, i32
  }
  func.func @transform_6(%arg0: i32) -> (i32, i32) {
    %c0_i32 = arith.constant 0 : i32
    %c0_i32_0 = arith.constant 0 : i32
    %c0_i32_1 = arith.constant 0 : i32
    return %c0_i32, %c0_i32_0 : i32, i32
  }
  func.func @transform_7(%arg0: i32) -> (i32, i32) {
    %c0_i32 = arith.constant 0 : i32
    %c0_i32_0 = arith.constant 0 : i32
    %c0_i32_1 = arith.constant 0 : i32
    return %c0_i32, %c0_i32_0 : i32, i32
  }
  func.func @transform_8(%arg0: i32) -> (i32, i32) {
    %c0_i32 = arith.constant 0 : i32
    %c0_i32_0 = arith.constant 0 : i32
    %c0_i32_1 = arith.constant 0 : i32
    return %c0_i32, %c0_i32_0 : i32, i32
  }
  func.func @transform_9(%arg0: i32) -> (i32, i32) {
    %c0_i32 = arith.constant 0 : i32
    %c0_i32_0 = arith.constant 0 : i32
    return %arg0, %c0_i32 : i32, i32
  }
}

</mosaic_0001>

<bundles_post_ra>
// kernel: tpu_custom_call.1
= control target key start
LH: loop header
LB: loop body
LE: loop exit
PB: predicated region body
PF: predicated region fallthrough
CT: control target
= control target key end

     0   :  { %14 = vsyncpa [#allocation3], 0  ;;  %s1067_s0 = inlined_call_operand.hbm [shape: f32[8,128], index: 0, kind: input, shape index: {}]   ;;  %s1068_s1 = inlined_call_operand.hbm [shape: f32[8,128], index: 1, kind: input, shape index: {}]   ;;  %s1069_s2 = inlined_call_operand.hbm [shape: f32[128,128], index: 2, kind: input, shape index: {}]   ;;  %s1070_s3 = inlined_call_operand.hbm [shape: f32[128,128], index: 3, kind: input, shape index: {}]   ;;  %s1071_s4 = inlined_call_operand.vmem [shape: f32[1,128], index: 4, kind: input, shape index: {}]   ;;  %s1072_s5 = inlined_call_operand.hbm [shape: f32[128,128], index: 5, kind: input, shape index: {}]   ;;  %s1073_s6 = inlined_call_operand.vmem [shape: f32[1,128], index: 6, kind: input, shape index: {}]   ;;  %s1074_s7 = inlined_call_operand.hbm [shape: f32[128,128], index: 7, kind: input, shape index: {}]   ;;  %s1075_s8 = inlined_call_operand.vmem [shape: f32[1,128], index: 8, kind: input, shape index: {}]   ;;  %s1076_s9 = inlined_call_operand.hbm [shape: f32[8,128], index: 9, kind: output, shape index: {}]  }
   0x1   :  { %15 = vsyncpa [#allocation6], 0 }
   0x2   :  { %16 = vsyncpa [#allocation9], 0 }
   0x3   :  { %17 = vsyncpa [#allocation12], 0 }
   0x4   :  { %18 = vsyncpa [#allocation4], 0  ;;  %s884_s30 = smov [#allocation5]  }
   0x5   :  { %s35_s10 = sshll.u32 %s884_s30, 4  ;;  %s36_s10 = int_to_ptr.vmem [resolvable:$true] %s35_s10 }
   0x6   :  { %s742_s11 = scalar_lea.vmem %s36_s10, 128  ;;  %p747_p1 = scmp.lt.s32.totalorder %s36_s10, %s36_s10 }
   0x7   :  { %p743_p0 = scmp.ne.s32.totalorder %s36_s10, %s742_s11  ;;  %p748_p2 = scmp.lt.s32.totalorder %s742_s11, %s742_s11 }
   0x9   :  { %p749_p3 = por %p748_p2, %p747_p1 }
   0xb   :  { %p750_p4 = pnand %p749_p3, %p743_p0 }
   0xd   :  { %753 = shalt.err (!%p750_p4)
}
   0xe   :  { %38 = dma.hbm_to_vmem [thread:$0]  %s1068_s1, 128, %s36_s10, [#allocation6]  }
   0xf   :  { %s885_s14 = smov [#allocation8]   ;;  %s886_s16 = smov [#allocation2]  }
  0x10   :  { %s56_s15 = sshll.u32 %s885_s14, 4  ;;  %s25_s17 = sshll.u32 %s886_s16, 4  ;;  %s57_s15 = int_to_ptr.vmem [resolvable:$true] %s56_s15  ;;  %s26_s17 = int_to_ptr.vmem [resolvable:$true] %s25_s17 }
  0x11   :  { %s762_s18 = scalar_lea.vmem %s57_s15, 2048  ;;  %p767_p6 = scmp.lt.s32.totalorder %s57_s15, %s57_s15 }
  0x12   :  { %p763_p5 = scmp.ne.s32.totalorder %s57_s15, %s762_s18  ;;  %p768_p7 = scmp.lt.s32.totalorder %s762_s18, %s762_s18 }
  0x14   :  { %p769_p8 = por %p768_p7, %p767_p6 }
  0x16   :  { %p770_p9 = pnand %p769_p8, %p763_p5 }
  0x18   :  { %773 = shalt.err (!%p770_p9)
}
  0x19   :  { %s887_s19 = smov 128   ;;  %s888_s20 = smov 8  }
  0x1a   :  { %62 = dma.hbm_to_vmem [thread:$0]  %s1070_s3, 2048, %s57_s15, [#allocation9], %s887_s19, %s887_s19, %s888_s20  }
  0x1b   :  { %s782_s1 = scalar_lea.vmem %s26_s17, 128  ;;  %p787_p11 = scmp.lt.s32.totalorder %s26_s17, %s26_s17 }
  0x1c   :  { %p783_p10 = scmp.ne.s32.totalorder %s26_s17, %s782_s1  ;;  %p788_p12 = scmp.lt.s32.totalorder %s782_s1, %s782_s1 }
  0x1e   :  { %p789_p13 = por %p788_p12, %p787_p11 }
  0x20   :  { %p790_p0 = pnand %p789_p13, %p783_p10 }
  0x22   :  { %793 = shalt.err (!%p790_p0)
}
  0x23   :  { %28 = dma.hbm_to_vmem [thread:$0]  %s1067_s0, 128, %s26_s17, [#allocation3]  }
  0x24   :  { %s889_s25 = smov [#allocation7]   ;;  %s890_s27 = smov [#allocation10]  }
  0x25   :  { %s44_s26 = sshll.u32 %s889_s25, 4  ;;  %s70_s28 = sshll.u32 %s890_s27, 4  ;;  %s45_s26 = int_to_ptr.vmem [resolvable:$true] %s44_s26  ;;  %s71_s28 = int_to_ptr.vmem [resolvable:$true] %s70_s28 }
  0x26   :  { %s802_s29 = scalar_lea.vmem %s45_s26, 2048  ;;  %p807_p2 = scmp.lt.s32.totalorder %s45_s26, %s45_s26 }
  0x27   :  { %p803_p1 = scmp.ne.s32.totalorder %s45_s26, %s802_s29  ;;  %p808_p3 = scmp.lt.s32.totalorder %s802_s29, %s802_s29 }
  0x29   :  { %p809_p4 = por %p808_p3, %p807_p2 }
  0x2b   :  { %p810_p5 = pnand %p809_p4, %p803_p1 }
  0x2d   :  { %813 = shalt.err (!%p810_p5)
}
  0x2e   :  { %50 = dma.hbm_to_vmem [thread:$0]  %s1069_s2, 2048, %s45_s26, [#allocation6], %s887_s19, %s887_s19, %s888_s20  }
  0x2f   :  { %s822_s0 = scalar_lea.vmem %s71_s28, 2048  ;;  %p827_p7 = scmp.lt.s32.totalorder %s71_s28, %s71_s28 }
  0x30   :  { %p823_p6 = scmp.ne.s32.totalorder %s71_s28, %s822_s0  ;;  %p828_p8 = scmp.lt.s32.totalorder %s822_s0, %s822_s0 }
  0x32   :  { %p829_p9 = por %p828_p8, %p827_p7 }
  0x34   :  { %p830_p10 = pnand %p829_p9, %p823_p6 }
  0x36   :  { %833 = shalt.err (!%p830_p10)
}
  0x37   :  { %76 = dma.hbm_to_vmem [thread:$0]  %s1072_s5, 2048, %s71_s28, [#allocation9], %s887_s19, %s887_s19, %s888_s20  }
  0x38   :  { %s891_s12 = smov [#allocation11]  }
  0x39   :  { %s84_s13 = sshll.u32 %s891_s12, 4  ;;  %s85_s13 = int_to_ptr.vmem [resolvable:$true] %s84_s13 }
  0x3a   :  { %s842_s14 = scalar_lea.vmem %s85_s13, 2048  ;;  %p847_p12 = scmp.lt.s32.totalorder %s85_s13, %s85_s13 }
  0x3b   :  { %p843_p11 = scmp.ne.s32.totalorder %s85_s13, %s842_s14  ;;  %p848_p13 = scmp.lt.s32.totalorder %s842_s14, %s842_s14 }
  0x3d   :  { %p849_p0 = por %p848_p13, %p847_p12 }
  0x3f   :  { %p850_p1 = pnand %p849_p0, %p843_p11 }
  0x41   :  { %853 = shalt.err (!%p850_p1)
}
  0x42   :  { %90 = dma.hbm_to_vmem [thread:$0]  %s1074_s7, 2048, %s85_s13, [#allocation12], %s887_s19, %s887_s19, %s888_s20  }
  0x43   :  { %874 = dma.done.wait [#allocation3], 128  }
  0x44   :  { %875 = vsyncadd [#allocation3], 4294967168 }
  0x45   :  { %876 = dma.done.wait [#allocation6], 2176  }
  0x46   :  { %877 = vsyncadd [#allocation6], 4294965120 }
  0x47   :  { %878 = dma.done.wait [#allocation9], 4096  }
  0x48   :  { %879 = vsyncadd [#allocation9], 4294963200 }
  0x49   :  { %880 = dma.done.wait [#allocation12], 2048  }
  0x4a   :  { %881 = vsyncadd [#allocation12], 4294965248  ;;  %v892_v0 = vmov 0.0   ;;  %vm893_vm0 = vmmov 0   ;;  %v144_v1 = vld [vmem:[#allocation8 + $0x78] sm:$0xff]  ;;  %v143_v3 = vld [vmem:[#allocation8 + $0x70] sm:$0xff] }
  0x4b   :  { %579 = vmatprep.subr.mxu0 %v892_v0  ;;  %614 = vmatprep.subr.mxu1 %v892_v0  ;;  %v128_v2 = vld [vmem:[#allocation7 + $0x78] sm:$0xff]  ;;  %v127_v4 = vld [vmem:[#allocation7 + $0x70] sm:$0xff]  ;;  %v142_v5 = vld [vmem:[#allocation8 + $0x68] sm:$0xff] }
  0x4c   :  { %611 = vmatprep.mubr.msk.f32.mxu0 %vm893_vm0, %v892_v0  ;;  %646 = vmatprep.mubr.msk.f32.mxu1 %vm893_vm0, %v892_v0  ;;  %v126_v6 = vld [vmem:[#allocation7 + $0x68] sm:$0xff]  ;;  %v141_v7 = vld [vmem:[#allocation8 + $0x60] sm:$0xff]  ;;  %v140_v9 = vld [vmem:[#allocation8 + $0x58] sm:$0xff] }
  0x4d   :  { %580 = vmatpush3.msra.mxu0 %v144_v1  ;;  %615 = vmatpush3.msra.mxu1 %v128_v2  ;;  %v125_v8 = vld [vmem:[#allocation7 + $0x60] sm:$0xff]  ;;  %v124_v10 = vld [vmem:[#allocation7 + $0x58] sm:$0xff]  ;;  %v139_v11 = vld [vmem:[#allocation8 + $0x50] sm:$0xff] }
  0x4e   :  { %581 = vmatprep.subr.mxu0 %v892_v0  ;;  %616 = vmatprep.subr.mxu1 %v892_v0  ;;  %v123_v12 = vld [vmem:[#allocation7 + $0x50] sm:$0xff]  ;;  %v138_v13 = vld [vmem:[#allocation8 + $0x48] sm:$0xff]  ;;  %v137_v15 = vld [vmem:[#allocation8 + $0x40] sm:$0xff] }
  0x4f   :  { %582 = vmatpush3.msra.mxu0 %v143_v3  ;;  %617 = vmatpush3.msra.mxu1 %v127_v4  ;;  %v122_v14 = vld [vmem:[#allocation7 + $0x48] sm:$0xff]  ;;  %v121_v16 = vld [vmem:[#allocation7 + $0x40] sm:$0xff]  ;;  %v136_v17 = vld [vmem:[#allocation8 + $0x38] sm:$0xff] }
  0x50   :  { %583 = vmatprep.subr.mxu0 %v892_v0  ;;  %618 = vmatprep.subr.mxu1 %v892_v0  ;;  %v120_v18 = vld [vmem:[#allocation7 + $0x38] sm:$0xff]  ;;  %v135_v19 = vld [vmem:[#allocation8 + $0x30] sm:$0xff]  ;;  %v134_v21 = vld [vmem:[#allocation8 + $0x28] sm:$0xff] }
  0x51   :  { %584 = vmatpush3.msra.mxu0 %v142_v5  ;;  %619 = vmatpush3.msra.mxu1 %v126_v6  ;;  %v119_v20 = vld [vmem:[#allocation7 + $0x30] sm:$0xff]  ;;  %v118_v22 = vld [vmem:[#allocation7 + $0x28] sm:$0xff]  ;;  %v133_v23 = vld [vmem:[#allocation8 + $0x20] sm:$0xff] }
  0x52   :  { %585 = vmatprep.subr.mxu0 %v892_v0  ;;  %620 = vmatprep.subr.mxu1 %v892_v0  ;;  %v117_v24 = vld [vmem:[#allocation7 + $0x20] sm:$0xff]  ;;  %v132_v25 = vld [vmem:[#allocation8 + $0x18] sm:$0xff]  ;;  %v131_v27 = vld [vmem:[#allocation8 + $0x10] sm:$0xff] }
  0x53   :  { %586 = vmatpush3.msra.mxu0 %v141_v7  ;;  %621 = vmatpush3.msra.mxu1 %v125_v8  ;;  %v116_v26 = vld [vmem:[#allocation7 + $0x18] sm:$0xff]  ;;  %v115_v28 = vld [vmem:[#allocation7 + $0x10] sm:$0xff]  ;;  %v130_v29 = vld [vmem:[#allocation8 + $0x8] sm:$0xff] }
  0x54   :  { %587 = vmatprep.subr.mxu0 %v892_v0  ;;  %622 = vmatprep.subr.mxu1 %v892_v0  ;;  %v114_v30 = vld [vmem:[#allocation7 + $0x8] sm:$0xff]  ;;  %v129_v31 = vld [vmem:[#allocation8] sm:$0xff]  ;;  %v1009_v33 = vld [vmem:[#allocation5] sm:$0xff] }
  0x55   :  { %588 = vmatpush3.msra.mxu0 %v140_v9  ;;  %623 = vmatpush3.msra.mxu1 %v124_v10  ;;  %v113_v32 = vld [vmem:[#allocation7] sm:$0xff]  ;;  %v1011_v34 = vld [vmem:[#allocation2] sm:$0xff]  ;;  %v314_v35 = vld [vmem:[#allocation10 + $0x78] sm:$0xff] }
  0x56   :  { %589 = vmatprep.subr.mxu0 %v892_v0  ;;  %624 = vmatprep.subr.mxu1 %v892_v0  ;;  %v407_v36 = vld [vmem:[#allocation11 + $0x78] sm:$0xff]  ;;  %v313_v37 = vld [vmem:[#allocation10 + $0x70] sm:$0xff]  ;;  %v312_v39 = vld [vmem:[#allocation10 + $0x68] sm:$0xff] }
  0x57   :  { %590 = vmatpush3.msra.mxu0 %v139_v11  ;;  %625 = vmatpush3.msra.mxu1 %v123_v12  ;;  %v406_v38 = vld [vmem:[#allocation11 + $0x70] sm:$0xff]  ;;  %v405_v40 = vld [vmem:[#allocation11 + $0x68] sm:$0xff]  ;;  %v311_v41 = vld [vmem:[#allocation10 + $0x60] sm:$0xff] }
  0x58   :  { %591 = vmatprep.subr.mxu0 %v892_v0  ;;  %626 = vmatprep.subr.mxu1 %v892_v0  ;;  %v404_v42 = vld [vmem:[#allocation11 + $0x60] sm:$0xff]  ;;  %v310_v43 = vld [vmem:[#allocation10 + $0x58] sm:$0xff]  ;;  %v309_v45 = vld [vmem:[#allocation10 + $0x50] sm:$0xff] }
  0x59   :  { %592 = vmatpush3.msra.mxu0 %v138_v13  ;;  %627 = vmatpush3.msra.mxu1 %v122_v14  ;;  %v403_v44 = vld [vmem:[#allocation11 + $0x58] sm:$0xff]  ;;  %v402_v46 = vld [vmem:[#allocation11 + $0x50] sm:$0xff]  ;;  %v308_v47 = vld [vmem:[#allocation10 + $0x48] sm:$0xff] }
  0x5a   :  { %593 = vmatprep.subr.mxu0 %v892_v0  ;;  %628 = vmatprep.subr.mxu1 %v892_v0  ;;  %v401_v48 = vld [vmem:[#allocation11 + $0x48] sm:$0xff]  ;;  %v307_v49 = vld [vmem:[#allocation10 + $0x40] sm:$0xff]  ;;  %v306_v51 = vld [vmem:[#allocation10 + $0x38] sm:$0xff] }
  0x5b   :  { %594 = vmatpush3.msra.mxu0 %v137_v15  ;;  %629 = vmatpush3.msra.mxu1 %v121_v16  ;;  %v400_v50 = vld [vmem:[#allocation11 + $0x40] sm:$0xff]  ;;  %v399_v52 = vld [vmem:[#allocation11 + $0x38] sm:$0xff]  ;;  %v305_v53 = vld [vmem:[#allocation10 + $0x30] sm:$0xff] }
  0x5c   :  { %595 = vmatprep.subr.mxu0 %v892_v0  ;;  %630 = vmatprep.subr.mxu1 %v892_v0  ;;  %v398_v54 = vld [vmem:[#allocation11 + $0x30] sm:$0xff]  ;;  %v304_v55 = vld [vmem:[#allocation10 + $0x28] sm:$0xff]  ;;  %v303_v57 = vld [vmem:[#allocation10 + $0x20] sm:$0xff] }
  0x5d   :  { %596 = vmatpush3.msra.mxu0 %v136_v17  ;;  %631 = vmatpush3.msra.mxu1 %v120_v18  ;;  %v397_v56 = vld [vmem:[#allocation11 + $0x28] sm:$0xff]  ;;  %v396_v58 = vld [vmem:[#allocation11 + $0x20] sm:$0xff]  ;;  %v302_v59 = vld [vmem:[#allocation10 + $0x18] sm:$0xff] }
  0x5e   :  { %597 = vmatprep.subr.mxu0 %v892_v0  ;;  %632 = vmatprep.subr.mxu1 %v892_v0  ;;  %v395_v60 = vld [vmem:[#allocation11 + $0x18] sm:$0xff]  ;;  %v301_v61 = vld [vmem:[#allocation10 + $0x10] sm:$0xff]  ;;  %v300_v63 = vld [vmem:[#allocation10 + $0x8] sm:$0xff] }
  0x5f   :  { %598 = vmatpush3.msra.mxu0 %v135_v19  ;;  %633 = vmatpush3.msra.mxu1 %v119_v20  ;;  %v394_v62 = vld [vmem:[#allocation11 + $0x10] sm:$0xff]  ;;  %v393_v1 = vld [vmem:[#allocation11 + $0x8] sm:$0xff]  ;;  %v299_v2 = vld [vmem:[#allocation10] sm:$0xff] }
  0x60   :  { %599 = vmatprep.subr.mxu0 %v892_v0  ;;  %634 = vmatprep.subr.mxu1 %v892_v0  ;;  %v392_v3 = vld [vmem:[#allocation11] sm:$0xff]  ;;  %v507_v6 = vld [vmem:[%s1071_s4] ss:$0 sm:$0xff]  ;;  %s894_s4 = smov [#allocation13]  }
  0x61   :  { %600 = vmatpush3.msra.mxu0 %v134_v21  ;;  %635 = vmatpush3.msra.mxu1 %v118_v22  ;;  %v510_v14 = vld [vmem:[%s1075_s8] ss:$0 sm:$0xff]  ;;  %s495_s20 = sshll.u32 %s894_s4, 4  ;;  %s496_s20 = int_to_ptr.vmem [resolvable:$true] %s495_s20 }
  0x62   :  { %601 = vmatprep.subr.mxu0 %v892_v0  ;;  %636 = vmatprep.subr.mxu1 %v892_v0  ;;  %s854_s21 = scalar_lea.vmem %s496_s20, 128  ;;  %p859_p3 = scmp.lt.s32.totalorder %s496_s20, %s496_s20 }
  0x63   :  { %602 = vmatpush3.msra.mxu0 %v133_v23  ;;  %637 = vmatpush3.msra.mxu1 %v117_v24  ;;  %p855_p2 = scmp.ne.s32.totalorder %s496_s20, %s854_s21  ;;  %p860_p4 = scmp.lt.s32.totalorder %s854_s21, %s854_s21 }
  0x64   :  { %603 = vmatprep.subr.mxu0 %v892_v0  ;;  %638 = vmatprep.subr.mxu1 %v892_v0 }
  0x65   :  { %604 = vmatpush3.msra.mxu0 %v132_v25  ;;  %639 = vmatpush3.msra.mxu1 %v116_v26  ;;  %p861_p5 = por %p860_p4, %p859_p3 }
  0x66   :  { %605 = vmatprep.subr.mxu0 %v892_v0  ;;  %640 = vmatprep.subr.mxu1 %v892_v0 }
  0x67   :  { %606 = vmatpush3.msra.mxu0 %v131_v27  ;;  %641 = vmatpush3.msra.mxu1 %v115_v28  ;;  %p862_p6 = pnand %p861_p5, %p855_p2 }
  0x68   :  { %607 = vmatprep.subr.mxu0 %v892_v0  ;;  %642 = vmatprep.subr.mxu1 %v892_v0 }
  0x69   :  { %608 = vmatpush3.msra.mxu0 %v130_v29  ;;  %643 = vmatpush3.msra.mxu1 %v114_v30 }
  0x6a   :  { %609 = vmatprep.subr.mxu0 %v892_v0  ;;  %644 = vmatprep.subr.mxu1 %v892_v0 }
  0x6b   :  { %610 = vmatpush3.msra.mxu0 %v129_v31  ;;  %645 = vmatpush3.msra.mxu1 %v113_v32 }
  0x6c   :  { %612 = vmatmul.mubr.f32.vlgmr.msra.gmra.mxu0 %v1009_v33  ;;  %647 = vmatmul.mubr.f32.vlgmr.msra.gmra.mxu1 %v1011_v34 }
  0x6d   :  { %649 = vmatprep.subr.mxu0 %v892_v0  ;;  %684 = vmatprep.subr.mxu1 %v892_v0 }
  0x6e   :  { %650 = vmatpush3.msra.mxu0 %v314_v35  ;;  %685 = vmatpush3.msra.mxu1 %v407_v36 }
  0x6f   :  { %651 = vmatprep.subr.mxu0 %v892_v0  ;;  %686 = vmatprep.subr.mxu1 %v892_v0 }
  0x70   :  { %652 = vmatpush3.msra.mxu0 %v313_v37  ;;  %687 = vmatpush3.msra.mxu1 %v406_v38 }
  0x71   :  { %653 = vmatprep.subr.mxu0 %v892_v0  ;;  %688 = vmatprep.subr.mxu1 %v892_v0 }
  0x72   :  { %654 = vmatpush3.msra.mxu0 %v312_v39  ;;  %689 = vmatpush3.msra.mxu1 %v405_v40 }
  0x73   :  { %655 = vmatprep.subr.mxu0 %v892_v0  ;;  %690 = vmatprep.subr.mxu1 %v892_v0 }
  0x74   :  { %656 = vmatpush3.msra.mxu0 %v311_v41  ;;  %691 = vmatpush3.msra.mxu1 %v404_v42 }
  0x75   :  { %657 = vmatprep.subr.mxu0 %v892_v0  ;;  %692 = vmatprep.subr.mxu1 %v892_v0 }
  0x76   :  { %658 = vmatpush3.msra.mxu0 %v310_v43  ;;  %693 = vmatpush3.msra.mxu1 %v403_v44 }
  0x77   :  { %659 = vmatprep.subr.mxu0 %v892_v0  ;;  %694 = vmatprep.subr.mxu1 %v892_v0 }
  0x78   :  { %660 = vmatpush3.msra.mxu0 %v309_v45  ;;  %695 = vmatpush3.msra.mxu1 %v402_v46 }
  0x79   :  { %661 = vmatprep.subr.mxu0 %v892_v0  ;;  %696 = vmatprep.subr.mxu1 %v892_v0 }
  0x7a   :  { %662 = vmatpush3.msra.mxu0 %v308_v47  ;;  %697 = vmatpush3.msra.mxu1 %v401_v48 }
  0x7b   :  { %663 = vmatprep.subr.mxu0 %v892_v0  ;;  %698 = vmatprep.subr.mxu1 %v892_v0 }
  0x7c   :  { %664 = vmatpush3.msra.mxu0 %v307_v49  ;;  %699 = vmatpush3.msra.mxu1 %v400_v50 }
  0x7d   :  { %665 = vmatprep.subr.mxu0 %v892_v0  ;;  %700 = vmatprep.subr.mxu1 %v892_v0 }
  0x7e   :  { %666 = vmatpush3.msra.mxu0 %v306_v51  ;;  %701 = vmatpush3.msra.mxu1 %v399_v52 }
  0x7f   :  { %667 = vmatprep.subr.mxu0 %v892_v0  ;;  %702 = vmatprep.subr.mxu1 %v892_v0 }
  0x80   :  { %668 = vmatpush3.msra.mxu0 %v305_v53  ;;  %703 = vmatpush3.msra.mxu1 %v398_v54 }
  0x81   :  { %669 = vmatprep.subr.mxu0 %v892_v0  ;;  %704 = vmatprep.subr.mxu1 %v892_v0 }
  0x82   :  { %670 = vmatpush3.msra.mxu0 %v304_v55  ;;  %705 = vmatpush3.msra.mxu1 %v397_v56 }
  0x83   :  { %671 = vmatprep.subr.mxu0 %v892_v0  ;;  %706 = vmatprep.subr.mxu1 %v892_v0 }
  0x84   :  { %672 = vmatpush3.msra.mxu0 %v303_v57  ;;  %707 = vmatpush3.msra.mxu1 %v396_v58 }
  0x85   :  { %673 = vmatprep.subr.mxu0 %v892_v0  ;;  %708 = vmatprep.subr.mxu1 %v892_v0 }
  0x86   :  { %674 = vmatpush3.msra.mxu0 %v302_v59  ;;  %709 = vmatpush3.msra.mxu1 %v395_v60 }
  0x87   :  { %675 = vmatprep.subr.mxu0 %v892_v0  ;;  %710 = vmatprep.subr.mxu1 %v892_v0 }
  0x88   :  { %676 = vmatpush3.msra.mxu0 %v301_v61  ;;  %711 = vmatpush3.msra.mxu1 %v394_v62 }
  0x89   :  { %677 = vmatprep.subr.mxu0 %v892_v0  ;;  %712 = vmatprep.subr.mxu1 %v892_v0 }
  0x8a   :  { %678 = vmatpush3.msra.mxu0 %v300_v63  ;;  %713 = vmatpush3.msra.mxu1 %v393_v1 }
  0x8b   :  { %679 = vmatprep.subr.mxu0 %v892_v0  ;;  %714 = vmatprep.subr.mxu1 %v892_v0 }
  0x8c   :  { %680 = vmatpush3.msra.mxu0 %v299_v2  ;;  %681 = vmatprep.mubr.msk.f32.mxu0 %vm893_vm0, %v892_v0 }
  0x8d   :  { %715 = vmatpush3.msra.mxu1 %v392_v3  ;;  %716 = vmatprep.mubr.msk.f32.mxu1 %vm893_vm0, %v892_v0  ;;  %v509_v0 = vld [vmem:[%s1073_s6] ss:$0 sm:$0xff] }
  0x8e   :  { %682 = vmatmul.mubr.f32.vlgmr.msra.gmra.mxu0 %v1011_v34  ;;  %717 = vmatmul.mubr.f32.vlgmr.msra.gmra.mxu1 %v1009_v33 }
 0x12c   :  { %v211_v4 = vpop.f32.mrf.mxu0  ;;  %v281_v5 = vpop.f32.mrf.mxu1 }
 0x12d   :  { %v282_v7 = vadd.f32 %v281_v5, %v211_v4 }
 0x12e   :  { %v613_v8 = vpop.f32.mrf.mxu0  ;;  %v648_v9 = vpop.f32.mrf.mxu1 }
 0x12f   :  { %v292_v10 = vadd.f32 %v507_v6, %v282_v7 }
 0x131   :  { %v508_v11 = vmul.f32 -1.442695, %v292_v10 }
 0x133   :  { %730 = vpow2.f32 %v508_v11 }
 0x140   :  { %v731_v12 = vpop.eup %730 }
 0x141   :  { %v296_v13 = vadd.f32 1.0, %v731_v12 }
 0x143   :  { %732 = vrcp.f32 %v296_v13 }
 0x14e   :  { %v388_v15 = vpop.f32.mrf.mxu0  ;;  %v481_v16 = vpop.f32.mrf.mxu1 }
 0x14f   :  { %v389_v17 = vadd.f32 %v509_v0, %v388_v15  ;;  %v482_v18 = vadd.f32 %v510_v14, %v481_v16 }
 0x150   :  { %v733_v19 = vpop.eup %732  ;;  %v683_v20 = vpop.f32.mrf.mxu0 }
 0x151   :  { %v718_v21 = vpop.f32.mrf.mxu1  ;;  %v485_v22 = vsub.f32 %v389_v17, %v482_v18 }
 0x153   :  { %v486_v23 = vmul.f32 %v733_v19, %v485_v22 }
 0x155   :  { %v487_v24 = vadd.f32 %v486_v23, %v482_v18 }
 0x157   :  { %488 = vst [vmem:[#allocation13] sm:$0xff] %v487_v24 }
 0x158   :  { %865 = shalt.err (!%p862_p6)
}
 0x159   :  { %498 = dma.vmem_to_hbm [thread:$0]  %s496_s20, 128, %s1076_s9, [#allocation4]  }
 0x15a   :  { %882 = dma.done.wait [#allocation4], 128  }
 0x15b   :  { %883 = vsyncadd [#allocation4], 4294967168 }
 0x15c   :  { %502 = vsyncpa [#allocation3], 1 }
 0x15d   :  { %503 = vsyncpa [#allocation6], 1 }
 0x15e   :  { %504 = vsyncpa [#allocation9], 1 }
 0x15f   :  { %505 = vsyncpa [#allocation12], 1 }
 0x160   :  { %506 = vsyncpa [#allocation4], 1 }

</bundles_post_ra>
